<compile_context>
chip_gen: v7x
topology: tpu7x:2x2x1
jax: 0.10.0
libtpu: 0.0.40
codegen_flags: <defaults>
</compile_context>

<pallas_src>
import functools

import jax
import jax.numpy as jnp
from jax.experimental import pallas as pl
from jax.experimental.pallas import tpu as pltpu

LN_EPS = 1e-5  # PyTorch nn.LayerNorm default
_SQRT_2_OVER_PI = 0.7978845608028654


# ---- math helpers ------------------------------------------------------------

def _gelu_tanh(x):
    # tanh-form GELU: the tanh goes to the EUP (otherwise idle VLIW slot).
    # Max deviation from PyTorch's exact-erf nn.GELU() is ~1e-3, well inside
    # the bf16-matmul tolerance used below.
    return 0.5 * x * (1.0 + jnp.tanh(_SQRT_2_OVER_PI * (x + 0.044715 * x * x * x)))


def _layernorm(x, gamma, beta):
    # Two-pass variance (x - mu)^2: numerically safe for non-zero-mean
    # activations (review correctness concern on mean(x^2) - mean(x)^2).
    mu = jnp.mean(x, axis=-1, keepdims=True)
    xc = x - mu
    var = jnp.mean(xc * xc, axis=-1, keepdims=True)
    return xc * jax.lax.rsqrt(var + LN_EPS) * gamma + beta


# ---- Pallas kernels ----------------------------------------------------------

def cls_fused_kernel(x_ref, w_emb_ref, w_down_ref, w_up_ref, w_proj_ref,
                     hvec_ref, b_down_ref, ovec_ref, out_ref, *, matmul_dtype):
    """CLS rows only: backbone stand-in -> adapter -> projector -> LayerNorm.

    hvec_ref = (4, H) packed [b_emb, adapter_ln_gamma, adapter_ln_beta, b_up]
    ovec_ref = (3, O) packed [b_proj, proj_ln_gamma, proj_ln_beta]
    """
    x = x_ref[...].astype(matmul_dtype)

    # backbone stand-in (TODO(synk) at top): last_hidden_state CLS rows
    h = (jnp.dot(x, w_emb_ref[...].astype(matmul_dtype),
                 preferred_element_type=jnp.float32) + hvec_ref[0:1, :])

    # AdapterLayer: residual + up(GELU(down(LayerNorm(h)))); dropout=identity.
    hn = _layernorm(h, hvec_ref[1:2, :], hvec_ref[2:3, :])
    d = _gelu_tanh(jnp.dot(hn.astype(matmul_dtype),
                           w_down_ref[...].astype(matmul_dtype),
                           preferred_element_type=jnp.float32) + b_down_ref[...])
    h = h + jnp.dot(d.astype(matmul_dtype), w_up_ref[...].astype(matmul_dtype),
                    preferred_element_type=jnp.float32) + hvec_ref[3:4, :]

    # projector: Linear -> LayerNorm -> Dropout(identity)
    p = (jnp.dot(h.astype(matmul_dtype), w_proj_ref[...].astype(matmul_dtype),
                 preferred_element_type=jnp.float32) + ovec_ref[0:1, :])
    out_ref[...] = _layernorm(p, ovec_ref[1:2, :], ovec_ref[2:3, :]).astype(out_ref.dtype)


def token_adapter_kernel(x_ref, w_emb_ref, w_down_ref, w_up_ref,
                         hvec_ref, b_down_ref, h_ref, *, matmul_dtype):
    """One row tile of tokens: h = adapter(backbone_stand_in(x_tile)).

    Used only for 'mean'/'max' pooling, where every token's adapted hidden
    state is actually consumed.  Output emitted in bf16 (halved HBM write).
    """
    x = x_ref[...].astype(matmul_dtype)
    h = (jnp.dot(x, w_emb_ref[...].astype(matmul_dtype),
                 preferred_element_type=jnp.float32) + hvec_ref[0:1, :])
    hn = _layernorm(h, hvec_ref[1:2, :], hvec_ref[2:3, :])
    d = _gelu_tanh(jnp.dot(hn.astype(matmul_dtype),
                           w_down_ref[...].astype(matmul_dtype),
                           preferred_element_type=jnp.float32) + b_down_ref[...])
    h_ref[...] = (h + jnp.dot(d.astype(matmul_dtype),
                              w_up_ref[...].astype(matmul_dtype),
                              preferred_element_type=jnp.float32)
                  + hvec_ref[3:4, :]).astype(h_ref.dtype)


# ---- wrapper -----------------------------------------------------------------

def _pick_tile(m, preferred=512):
    """Largest row tile <= preferred dividing m, preferring an EVEN grid length
    so dimension_semantics=("parallel",) shards tiles across v7x's 2 TCs."""
    cands = [c for c in (1024, 768, 512, 384, 256, 128, 64, 32, 16, 8)
             if c <= preferred and c <= m and m % c == 0]
    for c in cands:
        if (m // c) % 2 == 0:
            return c
    return cands[0] if cands else m


def _tolerance(matmul_dtype):
    if jnp.dtype(matmul_dtype) == jnp.dtype(jnp.bfloat16):
        # bf16 operand rounding through 4 chained GEMMs + final LayerNorm gain.
        return 5e-2, 5e-2
    return 5e-3, 5e-3  # tanh-GELU vs exact-erf reference


def audio_encoder_forward(x, params, *, pooling_strategy='cls',
                          matmul_dtype=jnp.bfloat16, hidden_dtype=jnp.bfloat16,
                          tile_m=512, input_buffer_count=2):
    """x: (B, S, F) float32 -> (B, output_dim) float32. Inference path."""
    B, S, F = x.shape
    H = params['w_emb'].shape[1]
    A = params['w_down'].shape[1]
    O = params['w_proj'].shape[1]

    cast = lambda a: a.astype(matmul_dtype)
    w_emb = cast(params['w_emb'])
    w_down = cast(params['w_down'])
    w_up = cast(params['w_up'])
    w_proj = cast(params['w_proj'])
    # Pack the tiny bias / LN-param vectors into two resident arrays.
    hvec = jnp.stack([params['b_emb'], params['a_ln_g'],
                      params['a_ln_b'], params['b_up']]).astype(jnp.float32)   # (4, H)
    b_down = params['b_down'].reshape(1, A).astype(jnp.float32)                # (1, A)
    ovec = jnp.stack([params['b_proj'], params['p_ln_g'],
                      params['p_ln_b']]).astype(jnp.float32)                   # (3, O)

    if pooling_strategy not in ('mean', 'max'):
        # 'cls' (module default, also the PyTorch else-branch) fast path:
        # only the CLS rows ever reach the output (adapter is per-token, h is
        # never exposed) -> one small fused kernel, no (B*S, H) HBM writeback,
        # no separate projector launch.
        Bp = max(8, ((B + 7) // 8) * 8)                 # pad to full sublanes
        cls_x = jnp.zeros((Bp, F), matmul_dtype).at[:B].set(cast(x[:, 0, :]))
        vmem = pl.BlockSpec(memory_space=pltpu.MemorySpace.VMEM)
        out = pl.pallas_call(
            functools.partial(cls_fused_kernel, matmul_dtype=matmul_dtype),
            out_shape=jax.ShapeDtypeStruct((Bp, O), jnp.float32),
            in_specs=[vmem] * 8,
            out_specs=vmem,
        )(cls_x, w_emb, w_down, w_up, w_proj, hvec, b_down, ovec)
        return out[:B]

    # -------- 'mean' / 'max' pooling: every token's adapted state is needed --
    M = B * S
    x2 = cast(x.reshape(M, F))                          # flatten tokens
    tm = _pick_tile(M, tile_m)
    grid = (M // tm,)

    if input_buffer_count == 2:
        x_spec = pl.BlockSpec((tm, F), lambda i: (i, 0))
    else:
        # v5e knob: deeper input buffering if a profile shows exposed DMA.
        x_spec = pl.BlockSpec((tm, F), lambda i: (i, 0),
                              pipeline_mode=pl.Buffered(input_buffer_count))

    resident = lambda shape: pl.BlockSpec(shape, lambda i: (0, 0))
    h_itemsize = jnp.dtype(hidden_dtype).itemsize
    cost = pl.CostEstimate(
        flops=2 * M * (F * H + H * A + A * H),
        transcendentals=M * (A + 1),                    # tanh per GELU elem + rsqrt per row
        bytes_accessed=(M * F * x2.dtype.itemsize + M * H * h_itemsize
                        + (F * H + H * A + A * H) * w_emb.dtype.itemsize
                        + (4 * H + A) * 4),
    )

    # NOTE: re-derive tile_m / vmem_limit for real AST dims (H~768) on v7x
    # (64 MiB physical VMEM); at these sizes 32 MiB leaves ample headroom.
    h = pl.pallas_call(
        functools.partial(token_adapter_kernel, matmul_dtype=matmul_dtype),
        out_shape=jax.ShapeDtypeStruct((M, H), hidden_dtype),
        grid=grid,
        in_specs=[x_spec,
                  resident((F, H)), resident((H, A)), resident((A, H)),
                  resident((4, H)), resident((1, A))],
        out_specs=pl.BlockSpec((tm, H), lambda i: (i, 0)),
        compiler_params=pltpu.CompilerParams(
            dimension_semantics=("parallel",),
            vmem_limit_bytes=32 * 1024 * 1024),
        cost_estimate=cost,
    )(x2, w_emb, w_down, w_up, hvec, b_down)

    h3 = h.reshape(B, S, H).astype(jnp.float32)
    pooled = jnp.mean(h3, axis=1) if pooling_strategy == 'mean' else jnp.max(h3, axis=1)
    # Projector on (B, H): sub-8-sublane rows -> a pallas launch is pure
    # overhead here (per review); plain XLA GEMM + LayerNorm instead.
    p = pooled @ params['w_proj'] + params['b_proj']
    return _layernorm(p, params['p_ln_g'], params['p_ln_b'])


# ---- pure-JAX reference (PyTorch semantics, exact erf GELU, f32) --------------

def reference_forward(x, params, pooling_strategy='cls'):
    h = jnp.einsum('bsf,fh->bsh', x, params['w_emb']) + params['b_emb']
    hn = _layernorm(h, params['a_ln_g'], params['a_ln_b'])
    d = jax.nn.gelu(jnp.einsum('bsh,ha->bsa', hn, params['w_down'])
                    + params['b_down'], approximate=False)
    h = h + jnp.einsum('bsa,ah->bsh', d, params['w_up']) + params['b_up']
    if pooling_strategy == 'mean':
        pooled = jnp.mean(h, axis=1)
    elif pooling_strategy == 'max':
        pooled = jnp.max(h, axis=1)
    else:
        pooled = h[:, 0, :]
    p = pooled @ params['w_proj'] + params['b_proj']
    return _layernorm(p, params['p_ln_g'], params['p_ln_b'])


# ---- main --------------------------------------------------------------------

if __name__ == "__main__":
    key = jax.random.PRNGKey(0)
    keys = jax.random.split(key, 12)

    # Small but 128-aligned shapes (lane-dense, clean MXU tiles).
    # hidden_size H != output_dim O so the projector branch is active.
    B, S, F = 2, 256, 128     # batch, seq_len, feat_dim
    H, A, O = 256, 128, 128   # hidden_size, adapter_dim, output_dim

    x = jax.random.normal(keys[0], (B, S, F), dtype=jnp.float32)

    params = dict(
        # backbone stand-in (TODO(synk): real AST weights unavailable)
        w_emb=jax.random.normal(keys[1], (F, H), jnp.float32) / jnp.sqrt(F),
        b_emb=0.5 * jax.random.normal(keys[2], (H,), jnp.float32),
        # AdapterLayer (non-trivial LN params to exercise the LayerNorm path)
        a_ln_g=1.0 + 0.1 * jax.random.normal(keys[3], (H,), jnp.float32),
        a_ln_b=0.1 * jax.random.normal(keys[4], (H,), jnp.float32),
        w_down=jax.random.normal(keys[5], (H, A), jnp.float32) / jnp.sqrt(H),
        b_down=0.1 * jax.random.normal(keys[6], (A,), jnp.float32),
        w_up=jax.random.normal(keys[7], (A, H), jnp.float32) / jnp.sqrt(A),
        b_up=0.2 * jax.random.normal(keys[8], (H,), jnp.float32),
        # projector: Linear(H, O) + LayerNorm(O)
        w_proj=jax.random.normal(keys[9], (H, O), jnp.float32) / jnp.sqrt(H),
        b_proj=0.1 * jax.random.normal(keys[10], (1, O), jnp.float32).reshape(O),
        p_ln_g=1.0 + 0.1 * jax.random.normal(keys[11], (O,), jnp.float32),
        p_ln_b=jnp.zeros((O,), jnp.float32),
    )

    atol, rtol = _tolerance(jnp.bfloat16)   # default matmul_dtype is bf16

    # 1) 'cls' pooling (module default): fused CLS-only kernel.
    out_cls = jax.block_until_ready(audio_encoder_forward(x, params))
    ref_cls = reference_forward(x, params, pooling_strategy='cls')
    assert out_cls.shape == (B, O), out_cls.shape
    err_cls = float(jnp.max(jnp.abs(out_cls - ref_cls)))
    assert jnp.allclose(out_cls, ref_cls, atol=atol, rtol=rtol), f"cls err={err_cls}"

    # 2) 'mean' pooling: exercises the streaming per-token kernel.
    out_mean = jax.block_until_ready(
        audio_encoder_forward(x, params, pooling_strategy='mean'))
    ref_mean = reference_forward(x, params, pooling_strategy='mean')
    assert out_mean.shape == (B, O), out_mean.shape
    err_mean = float(jnp.max(jnp.abs(out_mean - ref_mean)))
    assert jnp.allclose(out_mean, ref_mean, atol=atol, rtol=rtol), f"mean err={err_mean}"

    print("KERNEL_OK")
</pallas_src>

<mosaic_0001>
module attributes {stable_mosaic.version = 11 : i64} {
  func.func @cls_fused_kernel(%arg0: memref<8x128xbf16, #tpu.memory_space<vmem>>, %arg1: memref<128x256xbf16, #tpu.memory_space<vmem>>, %arg2: memref<256x128xbf16, #tpu.memory_space<vmem>>, %arg3: memref<128x256xbf16, #tpu.memory_space<vmem>>, %arg4: memref<256x128xbf16, #tpu.memory_space<vmem>>, %arg5: memref<4x256xf32, #tpu.memory_space<vmem>>, %arg6: memref<1x128xf32, #tpu.memory_space<vmem>>, %arg7: memref<3x128xf32, #tpu.memory_space<vmem>>, %arg8: memref<8x128xf32, #tpu.memory_space<vmem>>) attributes {dimension_semantics = [], scalar_prefetch = 0 : i64, scratch_operands = 0 : i64, tpu.core_type = #tpu.core_type<tc>} {
    %c0 = arith.constant 0 : index
    %c0_0 = arith.constant 0 : index
    %0 = vector.load %arg0[%c0, %c0_0] : memref<8x128xbf16, #tpu.memory_space<vmem>>, vector<8x128xbf16>
    %c0_1 = arith.constant 0 : index
    %c0_2 = arith.constant 0 : index
    %1 = vector.load %arg1[%c0_1, %c0_2] : memref<128x256xbf16, #tpu.memory_space<vmem>>, vector<128x256xbf16>
    %cst = arith.constant dense<0.000000e+00> : vector<8x256xf32>
    %2 = tpu.matmul %0, %1, %cst {dimension_numbers = #tpu.dot_dimension_numbers<[1], [0], [0], [1], [0, 0, 1, 1], [], []>} : vector<8x128xbf16>, vector<128x256xbf16>, vector<8x256xf32> -> vector<8x256xf32>
    %c0_3 = arith.constant 0 : index
    %c0_4 = arith.constant 0 : index
    %3 = vector.load %arg5[%c0_3, %c0_4] : memref<4x256xf32, #tpu.memory_space<vmem>>, vector<1x256xf32>
    %4 = vector.broadcast %3 : vector<1x256xf32> to vector<8x256xf32>
    %5 = arith.addf %2, %4 : vector<8x256xf32>
    %c1 = arith.constant 1 : index
    %c0_5 = arith.constant 0 : index
    %6 = vector.load %arg5[%c1, %c0_5] : memref<4x256xf32, #tpu.memory_space<vmem>>, vector<1x256xf32>
    %c2 = arith.constant 2 : index
    %c0_6 = arith.constant 0 : index
    %7 = vector.load %arg5[%c2, %c0_6] : memref<4x256xf32, #tpu.memory_space<vmem>>, vector<1x256xf32>
    %cst_7 = arith.constant dense<0.000000e+00> : vector<8xf32>
    %8 = vector.multi_reduction <add>, %5, %cst_7 [1] : vector<8x256xf32> to vector<8xf32>
    %9 = vector.shape_cast %8 : vector<8xf32> to vector<8x1xf32>
    %cst_8 = arith.constant 2.560000e+02 : f32
    %10 = vector.broadcast %cst_8 : f32 to vector<8x1xf32>
    %11 = arith.divf %9, %10 : vector<8x1xf32>
    %12 = vector.broadcast %11 : vector<8x1xf32> to vector<8x256xf32>
    %13 = arith.subf %5, %12 : vector<8x256xf32>
    %14 = arith.mulf %13, %13 : vector<8x256xf32>
    %cst_9 = arith.constant dense<0.000000e+00> : vector<8xf32>
    %15 = vector.multi_reduction <add>, %14, %cst_9 [1] : vector<8x256xf32> to vector<8xf32>
    %16 = vector.shape_cast %15 : vector<8xf32> to vector<8x1xf32>
    %cst_10 = arith.constant 2.560000e+02 : f32
    %17 = vector.broadcast %cst_10 : f32 to vector<8x1xf32>
    %18 = arith.divf %16, %17 : vector<8x1xf32>
    %cst_11 = arith.constant 9.99999974E-6 : f32
    %19 = vector.broadcast %cst_11 : f32 to vector<8x1xf32>
    %20 = arith.addf %18, %19 : vector<8x1xf32>
    %21 = math.rsqrt %20 : vector<8x1xf32>
    %22 = vector.broadcast %21 : vector<8x1xf32> to vector<8x256xf32>
    %23 = arith.mulf %13, %22 : vector<8x256xf32>
    %24 = vector.broadcast %6 : vector<1x256xf32> to vector<8x256xf32>
    %25 = arith.mulf %23, %24 : vector<8x256xf32>
    %26 = vector.broadcast %7 : vector<1x256xf32> to vector<8x256xf32>
    %27 = arith.addf %25, %26 : vector<8x256xf32>
    %28 = arith.truncf %27 : vector<8x256xf32> to vector<8x256xbf16>
    %c0_12 = arith.constant 0 : index
    %c0_13 = arith.constant 0 : index
    %29 = vector.load %arg2[%c0_12, %c0_13] : memref<256x128xbf16, #tpu.memory_space<vmem>>, vector<256x128xbf16>
    %cst_14 = arith.constant dense<0.000000e+00> : vector<8x128xf32>
    %30 = tpu.matmul %28, %29, %cst_14 {dimension_numbers = #tpu.dot_dimension_numbers<[1], [0], [0], [1], [0, 0, 1, 1], [], []>} : vector<8x256xbf16>, vector<256x128xbf16>, vector<8x128xf32> -> vector<8x128xf32>
    %c0_15 = arith.constant 0 : index
    %c0_16 = arith.constant 0 : index
    %31 = vector.load %arg6[%c0_15, %c0_16] : memref<1x128xf32, #tpu.memory_space<vmem>>, vector<1x128xf32>
    %32 = vector.broadcast %31 : vector<1x128xf32> to vector<8x128xf32>
    %33 = arith.addf %30, %32 : vector<8x128xf32>
    %cst_17 = arith.constant 5.000000e-01 : f32
    %34 = vector.broadcast %cst_17 : f32 to vector<8x128xf32>
    %35 = arith.mulf %34, %33 : vector<8x128xf32>
    %cst_18 = arith.constant 4.471500e-02 : f32
    %36 = vector.broadcast %cst_18 : f32 to vector<8x128xf32>
    %37 = arith.mulf %36, %33 : vector<8x128xf32>
    %38 = arith.mulf %37, %33 : vector<8x128xf32>
    %39 = arith.mulf %38, %33 : vector<8x128xf32>
    %40 = arith.addf %33, %39 : vector<8x128xf32>
    %cst_19 = arith.constant 0.797884583 : f32
    %41 = vector.broadcast %cst_19 : f32 to vector<8x128xf32>
    %42 = arith.mulf %41, %40 : vector<8x128xf32>
    %43 = math.tanh %42 : vector<8x128xf32>
    %cst_20 = arith.constant 1.000000e+00 : f32
    %44 = vector.broadcast %cst_20 : f32 to vector<8x128xf32>
    %45 = arith.addf %44, %43 : vector<8x128xf32>
    %46 = arith.mulf %35, %45 : vector<8x128xf32>
    %47 = arith.truncf %46 : vector<8x128xf32> to vector<8x128xbf16>
    %c0_21 = arith.constant 0 : index
    %c0_22 = arith.constant 0 : index
    %48 = vector.load %arg3[%c0_21, %c0_22] : memref<128x256xbf16, #tpu.memory_space<vmem>>, vector<128x256xbf16>
    %cst_23 = arith.constant dense<0.000000e+00> : vector<8x256xf32>
    %49 = tpu.matmul %47, %48, %cst_23 {dimension_numbers = #tpu.dot_dimension_numbers<[1], [0], [0], [1], [0, 0, 1, 1], [], []>} : vector<8x128xbf16>, vector<128x256xbf16>, vector<8x256xf32> -> vector<8x256xf32>
    %50 = arith.addf %5, %49 : vector<8x256xf32>
    %c3 = arith.constant 3 : index
    %c0_24 = arith.constant 0 : index
    %51 = vector.load %arg5[%c3, %c0_24] : memref<4x256xf32, #tpu.memory_space<vmem>>, vector<1x256xf32>
    %52 = vector.broadcast %51 : vector<1x256xf32> to vector<8x256xf32>
    %53 = arith.addf %50, %52 : vector<8x256xf32>
    %54 = arith.truncf %53 : vector<8x256xf32> to vector<8x256xbf16>
    %c0_25 = arith.constant 0 : index
    %c0_26 = arith.constant 0 : index
    %55 = vector.load %arg4[%c0_25, %c0_26] : memref<256x128xbf16, #tpu.memory_space<vmem>>, vector<256x128xbf16>
    %cst_27 = arith.constant dense<0.000000e+00> : vector<8x128xf32>
    %56 = tpu.matmul %54, %55, %cst_27 {dimension_numbers = #tpu.dot_dimension_numbers<[1], [0], [0], [1], [0, 0, 1, 1], [], []>} : vector<8x256xbf16>, vector<256x128xbf16>, vector<8x128xf32> -> vector<8x128xf32>
    %c0_28 = arith.constant 0 : index
    %c0_29 = arith.constant 0 : index
    %57 = vector.load %arg7[%c0_28, %c0_29] : memref<3x128xf32, #tpu.memory_space<vmem>>, vector<1x128xf32>
    %58 = vector.broadcast %57 : vector<1x128xf32> to vector<8x128xf32>
    %59 = arith.addf %56, %58 : vector<8x128xf32>
    %c1_30 = arith.constant 1 : index
    %c0_31 = arith.constant 0 : index
    %60 = vector.load %arg7[%c1_30, %c0_31] : memref<3x128xf32, #tpu.memory_space<vmem>>, vector<1x128xf32>
    %c2_32 = arith.constant 2 : index
    %c0_33 = arith.constant 0 : index
    %61 = vector.load %arg7[%c2_32, %c0_33] : memref<3x128xf32, #tpu.memory_space<vmem>>, vector<1x128xf32>
    %cst_34 = arith.constant dense<0.000000e+00> : vector<8xf32>
    %62 = vector.multi_reduction <add>, %59, %cst_34 [1] : vector<8x128xf32> to vector<8xf32>
    %63 = vector.shape_cast %62 : vector<8xf32> to vector<8x1xf32>
    %cst_35 = arith.constant 1.280000e+02 : f32
    %64 = vector.broadcast %cst_35 : f32 to vector<8x1xf32>
    %65 = arith.divf %63, %64 : vector<8x1xf32>
    %66 = vector.broadcast %65 : vector<8x1xf32> to vector<8x128xf32>
    %67 = arith.subf %59, %66 : vector<8x128xf32>
    %68 = arith.mulf %67, %67 : vector<8x128xf32>
    %cst_36 = arith.constant dense<0.000000e+00> : vector<8xf32>
    %69 = vector.multi_reduction <add>, %68, %cst_36 [1] : vector<8x128xf32> to vector<8xf32>
    %70 = vector.shape_cast %69 : vector<8xf32> to vector<8x1xf32>
    %cst_37 = arith.constant 1.280000e+02 : f32
    %71 = vector.broadcast %cst_37 : f32 to vector<8x1xf32>
    %72 = arith.divf %70, %71 : vector<8x1xf32>
    %cst_38 = arith.constant 9.99999974E-6 : f32
    %73 = vector.broadcast %cst_38 : f32 to vector<8x1xf32>
    %74 = arith.addf %72, %73 : vector<8x1xf32>
    %75 = math.rsqrt %74 : vector<8x1xf32>
    %76 = vector.broadcast %75 : vector<8x1xf32> to vector<8x128xf32>
    %77 = arith.mulf %67, %76 : vector<8x128xf32>
    %78 = vector.broadcast %60 : vector<1x128xf32> to vector<8x128xf32>
    %79 = arith.mulf %77, %78 : vector<8x128xf32>
    %80 = vector.broadcast %61 : vector<1x128xf32> to vector<8x128xf32>
    %81 = arith.addf %79, %80 : vector<8x128xf32>
    %c0_39 = arith.constant 0 : index
    %c0_40 = arith.constant 0 : index
    %82 = vector.load %arg8[%c0_39, %c0_40] : memref<8x128xf32, #tpu.memory_space<vmem>>, vector<8x128xf32>
    tpu.vector_store %arg8[%c0_39, %c0_40], %81 {strides = array<i32>} : memref<8x128xf32, #tpu.memory_space<vmem>>, vector<8x128xf32>,
    return
  }
}

</mosaic_0001>

<bundles_post_ra>
// kernel: tpu_custom_call.1
= control target key start
LH: loop header
LB: loop body
LE: loop exit
PB: predicated region body
PF: predicated region fallthrough
CT: control target
= control target key end

     0   :  { %13 = vsyncpa [#allocation3], 0  ;;  %s1378_s0 = inlined_call_operand.hbm [shape: bf16[8,128], index: 0, kind: input, shape index: {}]   ;;  %s1379_s1 = inlined_call_operand.hbm [shape: bf16[128,256], index: 1, kind: input, shape index: {}]   ;;  %s1380_s2 = inlined_call_operand.hbm [shape: bf16[256,128], index: 2, kind: input, shape index: {}]   ;;  %s1381_s3 = inlined_call_operand.hbm [shape: bf16[128,256], index: 3, kind: input, shape index: {}]   ;;  %s1382_s4 = inlined_call_operand.hbm [shape: bf16[256,128], index: 4, kind: input, shape index: {}]   ;;  %s1383_s5 = inlined_call_operand.vmem [shape: f32[4,256], index: 5, kind: input, shape index: {}]   ;;  %s1384_s6 = inlined_call_operand.vmem [shape: f32[1,128], index: 6, kind: input, shape index: {}]   ;;  %s1385_s7 = inlined_call_operand.vmem [shape: f32[3,128], index: 7, kind: input, shape index: {}]   ;;  %s1386_s8 = inlined_call_operand.hbm [shape: f32[8,128], index: 8, kind: output, shape index: {}]  }
   0x1   :  { %14 = vsyncpa [#allocation6], 0 }
   0x2   :  { %15 = vsyncpa [#allocation9], 0 }
   0x3   :  { %16 = vsyncpa [#allocation4], 0  ;;  %s1204_s27 = smov [#allocation5]   ;;  %s1064_s9 = scalar_lea.hbm %s1379_s1, 2048 }
   0x4   :  { %s32_s28 = sshll.u32 %s1204_s27, 4  ;;  %p1065_p0 = scmp.ne.s32.totalorder %s1379_s1, %s1064_s9  ;;  %s33_s28 = int_to_ptr.vmem [resolvable:$true] %s32_s28 }
   0x5   :  { %p1068_p1 = scmp.lt.u32.totalorder %s1064_s9, %s1379_s1 }
   0x7   :  { %p1070_p2 = pnand %p1068_p1, %p1065_p0 }
   0x9   :  { %1073 = shalt.err (!%p1070_p2)
}
   0xa   :  { %s1074_s14 = scalar_lea.vmem %s33_s28, 2048  ;;  %p1079_p4 = scmp.lt.s32.totalorder %s33_s28, %s33_s28 }
   0xb   :  { %p1075_p3 = scmp.ne.s32.totalorder %s33_s28, %s1074_s14  ;;  %p1080_p5 = scmp.lt.s32.totalorder %s1074_s14, %s1074_s14 }
   0xd   :  { %p1081_p6 = por %p1080_p5, %p1079_p4 }
   0xf   :  { %p1082_p7 = pnand %p1081_p6, %p1075_p3 }
  0x11   :  { %1085 = shalt.err (!%p1082_p7)
}
  0x12   :  { %s1205_s15 = smov 128   ;;  %s1206_s16 = smov 8  }
  0x13   :  { %38 = dma.hbm_to_vmem [thread:$0]  %s1379_s1, 2048, %s33_s28, [#allocation6], %s1205_s15, %s1205_s15, %s1206_s16  }
  0x14   :  { %s1207_s19 = smov [#allocation8]   ;;  %s1208_s21 = smov [#allocation2]  }
  0x15   :  { %s56_s20 = sshll.u32 %s1207_s19, 4  ;;  %s23_s22 = sshll.u32 %s1208_s21, 4  ;;  %s57_s20 = int_to_ptr.vmem [resolvable:$true] %s56_s20  ;;  %s24_s22 = int_to_ptr.vmem [resolvable:$true] %s23_s22 }
  0x16   :  { %s1086_s25 = scalar_lea.hbm %s1381_s3, 2048 }
  0x17   :  { %p1087_p8 = scmp.ne.s32.totalorder %s1381_s3, %s1086_s25  ;;  %p1090_p9 = scmp.lt.u32.totalorder %s1086_s25, %s1381_s3 }
  0x19   :  { %p1092_p10 = pnand %p1090_p9, %p1087_p8 }
  0x1b   :  { %1095 = shalt.err (!%p1092_p10)
}
  0x1c   :  { %s1096_s1 = scalar_lea.vmem %s57_s20, 2048  ;;  %p1101_p12 = scmp.lt.s32.totalorder %s57_s20, %s57_s20 }
  0x1d   :  { %p1097_p11 = scmp.ne.s32.totalorder %s57_s20, %s1096_s1  ;;  %p1102_p13 = scmp.lt.s32.totalorder %s1096_s1, %s1096_s1 }
  0x1f   :  { %p1103_p0 = por %p1102_p13, %p1101_p12 }
  0x21   :  { %p1104_p1 = pnand %p1103_p0, %p1097_p11 }
  0x23   :  { %1107 = shalt.err (!%p1104_p1)
}
  0x24   :  { %62 = dma.hbm_to_vmem [thread:$0]  %s1381_s3, 2048, %s57_s20, [#allocation9], %s1205_s15, %s1205_s15, %s1206_s16  }
  0x25   :  { %s1108_s12 = scalar_lea.hbm %s1378_s0, 64 }
  0x26   :  { %p1109_p2 = scmp.ne.s32.totalorder %s1378_s0, %s1108_s12  ;;  %p1112_p3 = scmp.lt.u32.totalorder %s1108_s12, %s1378_s0 }
  0x28   :  { %p1114_p4 = pnand %p1112_p3, %p1109_p2 }
  0x2a   :  { %1117 = shalt.err (!%p1114_p4)
}
  0x2b   :  { %s1118_s19 = scalar_lea.vmem %s24_s22, 64  ;;  %p1123_p6 = scmp.lt.s32.totalorder %s24_s22, %s24_s22 }
  0x2c   :  { %p1119_p5 = scmp.ne.s32.totalorder %s24_s22, %s1118_s19  ;;  %p1124_p7 = scmp.lt.s32.totalorder %s1118_s19, %s1118_s19 }
  0x2e   :  { %p1125_p8 = por %p1124_p7, %p1123_p6 }
  0x30   :  { %p1126_p9 = pnand %p1125_p8, %p1119_p5 }
  0x32   :  { %1129 = shalt.err (!%p1126_p9)
}
  0x33   :  { %26 = dma.hbm_to_vmem [thread:$0]  %s1378_s0, 64, %s24_s22, [#allocation3]  }
  0x34   :  { %s1209_s16 = smov [#allocation7]   ;;  %s1130_s24 = scalar_lea.hbm %s1380_s2, 2048 }
  0x35   :  { %s44_s20 = sshll.u32 %s1209_s16, 4  ;;  %p1131_p10 = scmp.ne.s32.totalorder %s1380_s2, %s1130_s24  ;;  %s45_s20 = int_to_ptr.vmem [resolvable:$true] %s44_s20 }
  0x36   :  { %p1134_p11 = scmp.lt.u32.totalorder %s1130_s24, %s1380_s2 }
  0x38   :  { %p1136_p12 = pnand %p1134_p11, %p1131_p10 }
  0x3a   :  { %1139 = shalt.err (!%p1136_p12)
}
  0x3b   :  { %s1140_s30 = scalar_lea.vmem %s45_s20, 2048  ;;  %p1145_p0 = scmp.lt.s32.totalorder %s45_s20, %s45_s20 }
  0x3c   :  { %p1141_p13 = scmp.ne.s32.totalorder %s45_s20, %s1140_s30  ;;  %p1146_p1 = scmp.lt.s32.totalorder %s1140_s30, %s1140_s30 }
  0x3e   :  { %p1147_p2 = por %p1146_p1, %p1145_p0 }
  0x40   :  { %p1148_p3 = pnand %p1147_p2, %p1141_p13 }
  0x42   :  { %1151 = shalt.err (!%p1148_p3)
}
  0x43   :  { %s1210_s0 = smov 64   ;;  %s1211_s22 = smov 4  }
  0x44   :  { %50 = dma.hbm_to_vmem [thread:$0]  %s1380_s2, 2048, %s45_s20, [#allocation6], %s1210_s0, %s1210_s0, %s1211_s22  }
  0x45   :  { %s1212_s9 = smov [#allocation10]   ;;  %s1152_s13 = scalar_lea.hbm %s1382_s4, 2048 }
  0x46   :  { %s68_s10 = sshll.u32 %s1212_s9, 4  ;;  %p1153_p4 = scmp.ne.s32.totalorder %s1382_s4, %s1152_s13  ;;  %s69_s10 = int_to_ptr.vmem [resolvable:$true] %s68_s10 }
  0x47   :  { %p1156_p5 = scmp.lt.u32.totalorder %s1152_s13, %s1382_s4 }
  0x49   :  { %p1158_p6 = pnand %p1156_p5, %p1153_p4 }
  0x4b   :  { %1161 = shalt.err (!%p1158_p6)
}
  0x4c   :  { %s1162_s3 = scalar_lea.vmem %s69_s10, 2048  ;;  %p1167_p8 = scmp.lt.s32.totalorder %s69_s10, %s69_s10 }
  0x4d   :  { %p1163_p7 = scmp.ne.s32.totalorder %s69_s10, %s1162_s3  ;;  %p1168_p9 = scmp.lt.s32.totalorder %s1162_s3, %s1162_s3 }
  0x4f   :  { %p1169_p10 = por %p1168_p9, %p1167_p8 }
  0x51   :  { %p1170_p11 = pnand %p1169_p10, %p1163_p7 }
  0x53   :  { %1173 = shalt.err (!%p1170_p11)
}
  0x54   :  { %74 = dma.hbm_to_vmem [thread:$0]  %s1382_s4, 2048, %s69_s10, [#allocation9], %s1210_s0, %s1210_s0, %s1211_s22  }
  0x55   :  { %1196 = dma.done.wait [#allocation3], 64  }
  0x56   :  { %1197 = vsyncadd [#allocation3], 4294967232 }
  0x57   :  { %1198 = dma.done.wait [#allocation6], 4096  }
  0x58   :  { %1199 = vsyncadd [#allocation6], 4294963200 }
  0x59   :  { %1200 = dma.done.wait [#allocation9], 4096  }
  0x5a   :  { %1201 = vsyncadd [#allocation9], 4294963200  ;;  %v1213_v0 = vmov 0   ;;  %v978_v1 = vld [vmem:[#allocation5 + $0x4] ss:$8 sps:$4 sm:$0xff]   ;;  %v116_v18 = vlaneseq  ;;  %v1006_v43 = vld [vmem:[#allocation7 + $0x50] sm:$0xff]  }
  0x5b   :  { %238 = vmatprep.mubr.bf16.mxu0 %v1213_v0  ;;  %v980_v2 = vld [vmem:[#allocation5] ss:$8 sps:$4 sm:$0xff]   ;;  %206 = vmatprep.subr.bf16.mxu0 %v978_v1  ;;  %v981_v3 = vld [vmem:[#allocation5 + $0x14] ss:$8 sps:$4 sm:$0xff]   ;;  %v983_v4 = vld [vmem:[#allocation5 + $0x10] ss:$8 sps:$4 sm:$0xff]  }
  0x5c   :  { %207 = vmatpush1.bf16.msra.mxu0 %v980_v2  ;;  %v984_v5 = vld [vmem:[#allocation5 + $0x24] ss:$8 sps:$4 sm:$0xff]   ;;  %v986_v6 = vld [vmem:[#allocation5 + $0x20] ss:$8 sps:$4 sm:$0xff]   ;;  %v987_v7 = vld [vmem:[#allocation5 + $0x34] ss:$8 sps:$4 sm:$0xff]  }
  0x5d   :  { %208 = vmatprep.subr.bf16.mxu0 %v981_v3  ;;  %v989_v8 = vld [vmem:[#allocation5 + $0x30] ss:$8 sps:$4 sm:$0xff]   ;;  %v990_v9 = vld [vmem:[#allocation5 + $0x44] ss:$8 sps:$4 sm:$0xff]   ;;  %v992_v10 = vld [vmem:[#allocation5 + $0x40] ss:$8 sps:$4 sm:$0xff]  }
  0x5e   :  { %v993_v11 = vld [vmem:[#allocation5 + $0x54] ss:$8 sps:$4 sm:$0xff]   ;;  %v995_v12 = vld [vmem:[#allocation5 + $0x50] ss:$8 sps:$4 sm:$0xff]   ;;  %v996_v13 = vld [vmem:[#allocation5 + $0x64] ss:$8 sps:$4 sm:$0xff]  }
  0x5f   :  { %v998_v14 = vld [vmem:[#allocation5 + $0x60] ss:$8 sps:$4 sm:$0xff]   ;;  %v999_v15 = vld [vmem:[#allocation5 + $0x74] ss:$8 sps:$4 sm:$0xff]   ;;  %v1001_v16 = vld [vmem:[#allocation5 + $0x70] ss:$8 sps:$4 sm:$0xff]  }
  0x60   :  { %209 = vmatpush1.bf16.msra.mxu0 %v983_v4  ;;  %v97_v17 = vld [vmem:[#allocation2] sm:$0xf]  ;;  %v117_v19 = vshrl.u32 %v116_v18, 7  ;;  %v114_v21 = vld [vmem:[%s1383_s5] ss:$4 sm:$0x3] }
  0x61   :  { %210 = vmatprep.subr.bf16.mxu0 %v984_v5  ;;  %v1002_v32 = vld [vmem:[#allocation7 + $0x40] sm:$0xff]   ;;  %v1004_v34 = vld [vmem:[#allocation7 + $0x48] sm:$0xff]   ;;  %v1007_v44 = vld [vmem:[#allocation7 + $0x10] sm:$0xff]   ;;  %s1214_s28 = smov [#allocation11]  }
  0x62   :  { %v1320_v20 = vsub.s32 0, %v117_v19  ;;  %v1325_v22 = vsub.s32 1, %v117_v19  ;;  %v1003_v33 = vld [vmem:[#allocation7] sm:$0xff]   ;;  %923 = vmatprep.subr.bf16.mxu1 %v1002_v32  ;;  %v1005_v35 = vld [vmem:[#allocation7 + $0x8] sm:$0xff]   ;;  %v1008_v45 = vld [vmem:[#allocation7 + $0x58] sm:$0xff]   ;;  %s841_s9 = sshll.u32 %s1214_s28, 4  ;;  %s842_s9 = int_to_ptr.vmem [resolvable:$true] %s841_s9 }
  0x63   :  { %924 = vmatpush3.bf16.msra.mxu1 %v1003_v33  ;;  %v1009_v46 = vld [vmem:[#allocation7 + $0x18] sm:$0xff]   ;;  %v1010_v47 = vld [vmem:[#allocation7 + $0x60] sm:$0xff]   ;;  %v1012_v49 = vld [vmem:[#allocation7 + $0x68] sm:$0xff]   ;;  %s1174_s10 = scalar_lea.vmem %s842_s9, 128  ;;  %p1179_p13 = scmp.lt.s32.totalorder %s842_s9, %s842_s9 }
  0x64   :  { %211 = vmatpush1.bf16.msra.mxu0 %v986_v6  ;;  %v119_v23 = vrot.slane %v114_v21, %v1320_v20  ;;  %v123_v24 = vrot.slane %v114_v21, %v1325_v22  ;;  %925 = vmatprep.subr.bf16.mxu1 %v1004_v34  ;;  %v1011_v48 = vld [vmem:[#allocation7 + $0x20] sm:$0xff]   ;;  %v1013_v50 = vld [vmem:[#allocation7 + $0x28] sm:$0xff]   ;;  %v1014_v51 = vld [vmem:[#allocation7 + $0x70] sm:$0xff]   ;;  %p1175_p12 = scmp.ne.s32.totalorder %s842_s9, %s1174_s10  ;;  %p1180_p0 = scmp.lt.s32.totalorder %s1174_s10, %s1174_s10 }
  0x65   :  { %212 = vmatprep.subr.bf16.mxu0 %v987_v7  ;;  %v1015_v52 = vld [vmem:[#allocation7 + $0x30] sm:$0xff]   ;;  %v1016_v53 = vld [vmem:[#allocation7 + $0x78] sm:$0xff]   ;;  %v1030_v18 = vld [vmem:[#allocation8 + $0x40] ss:$8 sps:$4 sm:$0xff]  }
  0x66   :  { %v1017_v54 = vld [vmem:[#allocation7 + $0x38] sm:$0xff]   ;;  %v1045_v32 = vld [vmem:[#allocation10 + $0x8] sm:$0xff]   ;;  %v1046_v33 = vld [vmem:[#allocation10 + $0x50] sm:$0xff]   ;;  %p1181_p1 = por %p1180_p0, %p1179_p13 }
  0x67   :  { %926 = vmatpush3.bf16.msra.mxu1 %v1005_v35  ;;  %v868_v58 = vld [vmem:[%s1383_s5 + $0x1] ss:$4 sm:$0x3]  ;;  %v869_v59 = vld [vmem:[%s1383_s5 + $0x2] ss:$4 sm:$0x3] }
  0x68   :  { %213 = vmatpush1.bf16.msra.mxu0 %v989_v8  ;;  %927 = vmatprep.subr.bf16.mxu1 %v1006_v43  ;;  %v272_v60 = vrot.slane %v868_v58, %v1320_v20  ;;  %v276_v61 = vrot.slane %v868_v58, %v1325_v22  ;;  %v289_v1 = vrot.slane %v869_v59, %v1325_v22  ;;  %v1035_v19 = vld [vmem:[#allocation8 + $0x54] ss:$8 sps:$4 sm:$0xff]   ;;  %v1033_v21 = vld [vmem:[#allocation8 + $0x50] ss:$8 sps:$4 sm:$0xff]   ;;  %p1182_p2 = pnand %p1181_p1, %p1175_p12 }
  0x69   :  { %214 = vmatprep.subr.bf16.mxu0 %v990_v9  ;;  %v1020_v9 = vld [vmem:[#allocation8 + $0x4] ss:$8 sps:$4 sm:$0xff]   ;;  %v1047_v34 = vld [vmem:[#allocation10 + $0x10] sm:$0xff]   ;;  %v1048_v35 = vld [vmem:[#allocation10 + $0x58] sm:$0xff]  }
  0x6a   :  { %v1054_v58 = vld [vmem:[#allocation10 + $0x70] sm:$0xff]  }
  0x6b   :  { %928 = vmatpush3.bf16.msra.mxu1 %v1007_v44 }
  0x6c   :  { %215 = vmatpush1.bf16.msra.mxu0 %v992_v10  ;;  %929 = vmatprep.subr.bf16.mxu1 %v1008_v45  ;;  %v1018_v10 = vld [vmem:[#allocation8] ss:$8 sps:$4 sm:$0xff]  }
  0x6d   :  { %216 = vmatprep.subr.bf16.mxu0 %v993_v11  ;;  %v1023_v11 = vld [vmem:[#allocation8 + $0x14] ss:$8 sps:$4 sm:$0xff]  }
  0x6f   :  { %930 = vmatpush3.bf16.msra.mxu1 %v1009_v46 }
  0x70   :  { %217 = vmatpush1.bf16.msra.mxu0 %v995_v12  ;;  %931 = vmatprep.subr.bf16.mxu1 %v1010_v47  ;;  %v1021_v12 = vld [vmem:[#allocation8 + $0x10] ss:$8 sps:$4 sm:$0xff]  }
  0x71   :  { %218 = vmatprep.subr.bf16.mxu0 %v996_v13  ;;  %v1026_v13 = vld [vmem:[#allocation8 + $0x24] ss:$8 sps:$4 sm:$0xff]  }
  0x73   :  { %932 = vmatpush3.bf16.msra.mxu1 %v1011_v48 }
  0x74   :  { %219 = vmatpush1.bf16.msra.mxu0 %v998_v14  ;;  %933 = vmatprep.subr.bf16.mxu1 %v1012_v49  ;;  %v1024_v14 = vld [vmem:[#allocation8 + $0x20] ss:$8 sps:$4 sm:$0xff]  }
  0x75   :  { %220 = vmatprep.subr.bf16.mxu0 %v999_v15  ;;  %v1027_v15 = vld [vmem:[#allocation8 + $0x30] ss:$8 sps:$4 sm:$0xff]  }
  0x77   :  { %934 = vmatpush3.bf16.msra.mxu1 %v1013_v50 }
  0x78   :  { %221 = vmatpush1.bf16.msra.mxu0 %v1001_v16  ;;  %935 = vmatprep.subr.bf16.mxu1 %v1014_v51  ;;  %v1029_v16 = vld [vmem:[#allocation8 + $0x34] ss:$8 sps:$4 sm:$0xff]  }
  0x79   :  { %577 = vmatprep.subr.bf16.mxu0 %v1020_v9 }
  0x7b   :  { %239 = vmatmul.mubr.bf16.vlgmr.msra.gmra.mrb[0].mxu0 %v97_v17  ;;  %936 = vmatpush3.bf16.msra.mxu1 %v1015_v52  ;;  %v1032_v17 = vld [vmem:[#allocation8 + $0x44] ss:$8 sps:$4 sm:$0xff]  }
  0x7c   :  { %609 = vmatprep.mubr.bf16.mxu0 %v1213_v0  ;;  %937 = vmatprep.subr.bf16.mxu1 %v1016_v53  ;;  %v285_v0 = vrot.slane %v869_v59, %v1320_v20  ;;  %v1055_v59 = vld [vmem:[#allocation10 + $0x30] sm:$0xff]  }
  0x7d   :  { %578 = vmatpush1.bf16.msra.mxu0 %v1018_v10 }
  0x7e   :  { %579 = vmatprep.subr.bf16.mxu0 %v1023_v11 }
  0x7f   :  { %938 = vmatpush3.bf16.msra.mxu1 %v1017_v54 }
  0x81   :  { %580 = vmatpush1.bf16.msra.mxu0 %v1021_v12 }
  0x82   :  { %581 = vmatprep.subr.bf16.mxu0 %v1026_v13 }
  0x85   :  { %582 = vmatpush1.bf16.msra.mxu0 %v1024_v14 }
  0x86   :  { %583 = vmatprep.subr.bf16.mxu0 %v1029_v16 }
  0x89   :  { %584 = vmatpush1.bf16.msra.mxu0 %v1027_v15 }
  0x8a   :  { %585 = vmatprep.subr.bf16.mxu0 %v1032_v17 }
  0x8d   :  { %586 = vmatpush1.bf16.msra.mxu0 %v1030_v18 }
  0x8e   :  { %587 = vmatprep.subr.bf16.mxu0 %v1035_v19 }
  0x91   :  { %588 = vmatpush1.bf16.msra.mxu0 %v1033_v21 }
 0x14e   :  { %v240_v25 = vpop.f32.mrb[0].mxu0 }
 0x14f   :  { %v1329_v26 = vadd.f32 %v240_v25, %v119_v23  ;;  %v242_v27 = vpop.f32.mrb[1].mxu0  ;;  %v1038_v23 = vld [vmem:[#allocation8 + $0x64] ss:$8 sps:$4 sm:$0xff]   ;;  %v1041_v25 = vld [vmem:[#allocation8 + $0x74] ss:$8 sps:$4 sm:$0xff]  }
 0x150   :  { %v1331_v28 = vadd.f32 %v242_v27, %v123_v24  ;;  %v244_v29 = vpop.f32.mrb[2].mxu0  ;;  %v1036_v24 = vld [vmem:[#allocation8 + $0x60] ss:$8 sps:$4 sm:$0xff]   ;;  %589 = vmatprep.subr.bf16.mxu0 %v1038_v23  ;;  %v1039_v27 = vld [vmem:[#allocation8 + $0x70] ss:$8 sps:$4 sm:$0xff]  }
 0x151   :  { %v245_v30 = vpop.f32.mrb[3].mxu0  ;;  %590 = vmatpush1.bf16.msra.mxu0 %v1036_v24  ;;  %v1042_v29 = vld [vmem:[#allocation10 + $0x40] sm:$0xff]   ;;  %v921_v24 = vld [vmem:[%s1385_s7 + $0x1] ss:$0 sm:$0xff] }
 0x152   :  { %v251_v31 = vadd.f32 %v1331_v28, %v1329_v26  ;;  %591 = vmatprep.subr.bf16.mxu0 %v1041_v25  ;;  %v1043_v30 = vld [vmem:[#allocation10] sm:$0xff]   ;;  %945 = vmatprep.subr.bf16.mxu1 %v1042_v29 }
 0x154   :  { %252 = vadd.xlane.f32.xlu0 %v251_v31  ;;  %v1044_v31 = vld [vmem:[#allocation10 + $0x48] sm:$0xff]  }
 0x155   :  { %592 = vmatpush1.bf16.msra.mxu0 %v1039_v27  ;;  %v922_v27 = vld [vmem:[%s1385_s7 + $0x2] ss:$0 sm:$0xff] }
 0x1e1   :  { %v253_v36 = vpop.xlane.xlu0 %252 }
 0x1e2   :  { %v255_v37 = vmul.f32 0.00390625, %v253_v36  ;;  %v1049_v36 = vld [vmem:[#allocation10 + $0x18] sm:$0xff]  }
 0x1e4   :  { %v256_v38 = vsub.f32 %v1329_v26, %v255_v37  ;;  %v257_v39 = vsub.f32 %v1331_v28, %v255_v37  ;;  %v1050_v37 = vld [vmem:[#allocation10 + $0x60] sm:$0xff]  }
 0x1e6   :  { %v258_v40 = vmul.f32 %v256_v38, %v256_v38  ;;  %v259_v41 = vmul.f32 %v257_v39, %v257_v39 }
 0x1e8   :  { %v260_v42 = vadd.f32 %v259_v41, %v258_v40  ;;  %v1053_v40 = vld [vmem:[#allocation10 + $0x28] sm:$0xff]  }
 0x1ea   :  { %261 = vadd.xlane.f32.xlu0 %v260_v42  ;;  %v870_v42 = vld [vmem:[%s1384_s6] ss:$0 sm:$0xff] }
 0x277   :  { %v262_v55 = vpop.xlane.xlu0 %261 }
 0x278   :  { %v263_v56 = vmul.f32 0.00390625, %v262_v55 }
 0x27a   :  { %v264_v57 = vadd.f32 1e-05, %v263_v56 }
 0x27c   :  { %1058 = vrsqrt.f32 %v264_v57 }
 0x286   :  { %v1059_v62 = vpop.eup %1058 }
 0x287   :  { %v267_v63 = vmul.f32 %v1059_v62, %v257_v39  ;;  %v266_v2 = vmul.f32 %v1059_v62, %v256_v38  ;;  %v1051_v38 = vld [vmem:[#allocation10 + $0x20] sm:$0xff]   ;;  %v1052_v39 = vld [vmem:[#allocation10 + $0x68] sm:$0xff]   ;;  %v903_v62 = vld [vmem:[%s1383_s5 + $0x3] ss:$4 sm:$0x3] }
 0x289   :  { %v280_v3 = vmul.f32 %v276_v61, %v267_v63  ;;  %v279_v4 = vmul.f32 %v272_v60, %v266_v2  ;;  %v1056_v60 = vld [vmem:[#allocation10 + $0x78] sm:$0xff]   ;;  %v626_v63 = vrot.slane %v903_v62, %v1320_v20  ;;  %v904_v20 = vld [vmem:[%s1385_s7] ss:$0 sm:$0xff] }
 0x28a   :  { %v1057_v61 = vld [vmem:[#allocation10 + $0x38] sm:$0xff]  }
 0x28b   :  { %v293_v5 = vadd.f32 %v289_v1, %v280_v3  ;;  %v292_v6 = vadd.f32 %v285_v0, %v279_v4  ;;  %v630_v1 = vrot.slane %v903_v62, %v1325_v22 }
 0x28d   :  { %v295_v7 = vpack.c.bf16 %v293_v5, %v293_v5  ;;  %v294_v8 = vpack.c.bf16 %v292_v6, %v292_v6 }
 0x28f   :  { %463 = vmatprep.mubr.bf16.mxu1 %v295_v7 }
 0x290   :  { %464 = vmatmul.mubr.bf16.vlgmr.msra.gmra.mrb[0].mxu1 %v294_v8 }
 0x291   :  { %946 = vmatpush3.bf16.msra.mxu1 %v1043_v30 }
 0x292   :  { %947 = vmatprep.subr.bf16.mxu1 %v1044_v31 }
 0x295   :  { %948 = vmatpush3.bf16.msra.mxu1 %v1045_v32 }
 0x296   :  { %949 = vmatprep.subr.bf16.mxu1 %v1046_v33 }
 0x299   :  { %950 = vmatpush3.bf16.msra.mxu1 %v1047_v34 }
 0x29a   :  { %951 = vmatprep.subr.bf16.mxu1 %v1048_v35 }
 0x29d   :  { %952 = vmatpush3.bf16.msra.mxu1 %v1049_v36 }
 0x29e   :  { %953 = vmatprep.subr.bf16.mxu1 %v1050_v37 }
 0x2a1   :  { %954 = vmatpush3.bf16.msra.mxu1 %v1051_v38 }
 0x2a2   :  { %955 = vmatprep.subr.bf16.mxu1 %v1052_v39 }
 0x2a5   :  { %956 = vmatpush3.bf16.msra.mxu1 %v1053_v40 }
 0x2a6   :  { %957 = vmatprep.subr.bf16.mxu1 %v1054_v58 }
 0x2a9   :  { %958 = vmatpush3.bf16.msra.mxu1 %v1055_v59 }
 0x2aa   :  { %959 = vmatprep.subr.bf16.mxu1 %v1056_v60 }
 0x2ad   :  { %960 = vmatpush3.bf16.msra.mxu1 %v1057_v61 }
 0x363   :  { %v939_v41 = vpop.f32.mrb[0].mxu1 }
 0x364   :  { %v940_v43 = vpop.f32.mrb[1].mxu1 }
 0x365   :  { %v941_v44 = vadd.f32 %v940_v43, %v939_v41  ;;  %v942_v45 = vpop.f32.mrb[2].mxu1 }
 0x366   :  { %v943_v46 = vpop.f32.mrb[3].mxu1 }
 0x367   :  { %v466_v47 = vadd.f32 %v941_v44, %v870_v42 }
 0x369   :  { %v472_v48 = vmul.f32 0.044715, %v466_v47  ;;  %v471_v54 = vmul.f32 0.5, %v466_v47 }
 0x36b   :  { %v473_v49 = vmul.f32 %v472_v48, %v466_v47 }
 0x36d   :  { %v474_v50 = vmul.f32 %v473_v49, %v466_v47 }
 0x36f   :  { %v475_v51 = vadd.f32 %v474_v50, %v466_v47 }
 0x371   :  { %v476_v52 = vmul.f32 0.7978846, %v475_v51 }
 0x373   :  { %1060 = vtanh.f32 %v476_v52 }
 0x37d   :  { %v1061_v53 = vpop.eup %1060 }
 0x37e   :  { %v478_v55 = vadd.f32 1.0, %v1061_v53 }
 0x380   :  { %v479_v56 = vmul.f32 %v478_v55, %v471_v54 }
 0x382   :  { %v480_v57 = vpack.c.bf16 %v479_v56, %v479_v56 }
 0x384   :  { %610 = vmatmul.mubr.bf16.vlgmr.msra.gmra.mrb[4].mxu0 %v480_v57 }
 0x457   :  { %v611_v0 = vpop.f32.mrb[4].mxu0 }
 0x458   :  { %v618_v2 = vadd.f32 %v611_v0, %v1329_v26  ;;  %v613_v3 = vpop.f32.mrb[5].mxu0 }
 0x459   :  { %v619_v4 = vadd.f32 %v613_v3, %v1331_v28  ;;  %v615_v5 = vpop.f32.mrb[6].mxu0 }
 0x45a   :  { %v633_v6 = vadd.f32 %v626_v63, %v618_v2  ;;  %v616_v7 = vpop.f32.mrb[7].mxu0 }
 0x45b   :  { %v634_v8 = vadd.f32 %v630_v1, %v619_v4 }
 0x45c   :  { %v635_v10 = vpack.c.bf16 %v633_v6, %v633_v6 }
 0x45d   :  { %v636_v9 = vpack.c.bf16 %v634_v8, %v634_v8 }
 0x45f   :  { %802 = vmatprep.mubr.bf16.mxu1 %v636_v9 }
 0x460   :  { %803 = vmatmul.mubr.bf16.vlgmr.msra.gmra.mrb[4].mxu1 %v635_v10 }
 0x533   :  { %v961_v11 = vpop.f32.mrb[4].mxu1 }
 0x534   :  { %v962_v12 = vpop.f32.mrb[5].mxu1 }
 0x535   :  { %v963_v22 = vadd.f32 %v962_v12, %v961_v11  ;;  %v964_v13 = vpop.f32.mrb[6].mxu1 }
 0x536   :  { %v965_v26 = vpop.f32.mrb[7].mxu1 }
 0x537   :  { %v805_v14 = vadd.f32 %v963_v22, %v904_v20 }
 0x539   :  { %812 = vadd.xlane.f32.xlu1 %v805_v14 }
 0x5c6   :  { %v813_v28 = vpop.xlane.xlu1 %812 }
 0x5c7   :  { %v815_v15 = vmul.f32 0.0078125, %v813_v28 }
 0x5c9   :  { %v816_v16 = vsub.f32 %v805_v14, %v815_v15 }
 0x5cb   :  { %v817_v17 = vmul.f32 %v816_v16, %v816_v16 }
 0x5cd   :  { %818 = vadd.xlane.f32.xlu1 %v817_v17 }
 0x65a   :  { %v819_v18 = vpop.xlane.xlu1 %818 }
 0x65b   :  { %v820_v19 = vmul.f32 0.0078125, %v819_v18 }
 0x65d   :  { %v821_v21 = vadd.f32 1e-05, %v820_v19 }
 0x65f   :  { %1062 = vrsqrt.f32 %v821_v21 }
 0x669   :  { %v1063_v23 = vpop.eup %1062 }
 0x66a   :  { %v823_v25 = vmul.f32 %v1063_v23, %v816_v16 }
 0x66c   :  { %v828_v29 = vmul.f32 %v921_v24, %v823_v25 }
 0x66e   :  { %v833_v30 = vadd.f32 %v922_v27, %v828_v29 }
 0x670   :  { %834 = vst [vmem:[#allocation11] sm:$0xff] %v833_v30 }
 0x671   :  { %1185 = shalt.err (!%p1182_p2)
}
 0x672   :  { %s1186_s13 = scalar_lea.hbm %s1386_s8, 128 }
 0x673   :  { %p1187_p3 = scmp.ne.s32.totalorder %s1386_s8, %s1186_s13  ;;  %p1190_p4 = scmp.lt.u32.totalorder %s1186_s13, %s1386_s8 }
 0x675   :  { %p1192_p5 = pnand %p1190_p4, %p1187_p3 }
 0x677   :  { %1195 = shalt.err (!%p1192_p5)
}
 0x678   :  { %844 = dma.vmem_to_hbm [thread:$0]  %s842_s9, 128, %s1386_s8, [#allocation4]  }
 0x679   :  { %1202 = dma.done.wait [#allocation4], 128  }
 0x67a   :  { %1203 = vsyncadd [#allocation4], 4294967168 }
 0x67b   :  { %848 = vsyncpa [#allocation3], 1 }
 0x67c   :  { %849 = vsyncpa [#allocation6], 1 }
 0x67d   :  { %850 = vsyncpa [#allocation9], 1 }
 0x67e   :  { %851 = vsyncpa [#allocation4], 1 }

</bundles_post_ra>
